<compile_context>
chip_gen: v7x
topology: tpu7x:2x2x1
jax: 0.10.0
libtpu: 0.0.40
codegen_flags: <defaults>
</compile_context>

<pallas_src>
import functools

import jax
import jax.numpy as jnp
from jax import lax
from jax.experimental import pallas as pl
from jax.experimental.pallas import tpu as pltpu


def _ts_conv_kernel(x_ref, w_ref, b_ref, o_ref, *, fold):
    """One (batch, hw-tile) block.

    x_ref : (1, T, C_in, L)    NCHW-style block, HW tile in the lane dim.
    w_ref : (C_out, C_in)      1x1-conv weight.
    b_ref : (C_out, 1)         bias column (lane-broadcast).
    o_ref : (1, T, C_out, L)
    """
    _, T, C, L = x_ref.shape
    w = w_ref[...]
    b = b_ref[...].astype(jnp.float32)  # broadcast once over (C_out, T*L)

    # Channel-group masks: channels live in the sublane dim -> cheap VPU selects.
    chan = lax.broadcasted_iota(jnp.int32, (C, L), 0)
    m_fwd = chan < fold          # out[t] <- x[t+1]  (shift "left" in time)
    m_bwd = chan < 2 * fold      # out[t] <- x[t-1]  (shift "right" in time)
    zeros = jnp.zeros((C, L), x_ref.dtype)

    # Rolling locals: each timestep row is read from VMEM exactly once.
    shifted_rows = []
    x_prev = zeros
    x_t = x_ref[0, 0]
    for t in range(T):           # T is small & static; unrolled
        x_next = x_ref[0, t + 1] if t + 1 < T else zeros
        shifted_rows.append(
            jnp.where(m_fwd, x_next, jnp.where(m_bwd, x_prev, x_t)))
        x_prev, x_t = x_t, x_next

    # One fused MXU call: weight stationary, T*L lane columns (L is a 128
    # multiple, so the concat and the slices below are layout-only).
    shifted_all = jnp.concatenate(shifted_rows, axis=-1)      # (C_in, T*L)
    y = jnp.dot(w, shifted_all, preferred_element_type=jnp.float32) + b

    for t in range(T):
        o_ref[0, t] = y[:, t * L:(t + 1) * L].astype(o_ref.dtype)


def _vmem_capacity_bytes():
    try:
        return int(pltpu.get_tpu_info().vmem_capacity_bytes)
    except Exception:
        return 64 * 1024 * 1024  # conservative (v7x per-TC)


def _pick_tile_hw(hw_pad, t_seg, c_in, c_out, itemsize, budget_bytes, max_tile_hw):
    """Largest 128-multiple tile of hw_pad whose pipelined footprint fits budget."""
    # Per HW column held in VMEM: double-buffered in + out blocks, plus the
    # in-kernel (C_in, T*L) shifted temp and the f32 (C_out, T*L) matmul result.
    per_col = (2 * t_seg * (c_in + c_out) * itemsize
               + t_seg * (c_in * itemsize + c_out * 4))
    cap = max(128, (budget_bytes // per_col) // 128 * 128)
    cap = min(cap, max_tile_hw, hw_pad)
    best = 128
    tile = 128
    while tile <= cap:
        if hw_pad % tile == 0:
            best = tile
        tile += 128
    return best


def temporal_shift_conv(x_nchw, weight, bias, *, n_segment=3, fold_div=8,
                        max_tile_hw=2048, compute_dtype=jnp.bfloat16):
    """TemporalShift(net=Conv2d(C_in, C_out, 1, bias=True)).forward.

    x_nchw: (NT, C_in, H, W). weight: (C_out, C_in, 1, 1). bias: (C_out,).
    compute_dtype: storage dtype for x / weight / bias inside the kernel
    (default bf16; fp32 accumulation is always kept). Pass jnp.float32 (or
    None for "no cast") for exact-precision runs.
    """
    nt, c_in, h, w = x_nchw.shape
    c_out = weight.shape[0]
    assert nt % n_segment == 0, "batch dim must be a multiple of n_segment"
    n_batch = nt // n_segment
    hw = h * w
    fold = c_in // fold_div

    # Pure reshapes only — NCHW stays NCHW, no HBM transpose passes.
    x_flat = x_nchw.reshape(nt, c_in, hw)
    w_mat = weight.reshape(c_out, c_in)       # (C_out, C_in): y = W @ x
    b_col = bias.reshape(c_out, 1)
    if compute_dtype is not None:
        x_flat = x_flat.astype(compute_dtype)
        w_mat = w_mat.astype(compute_dtype)
        b_col = b_col.astype(compute_dtype)

    # Pad HW up to a 128 multiple: lane-dense stores + restores HW tiling for
    # non-aligned spatial sizes (padded columns are zero and sliced off below).
    hw_pad = -(-hw // 128) * 128
    if hw_pad != hw:
        x_flat = jnp.pad(x_flat, ((0, 0), (0, 0), (0, hw_pad - hw)))
    x_r = x_flat.reshape(n_batch, n_segment, c_in, hw_pad)

    itemsize = jnp.dtype(x_r.dtype).itemsize
    capacity = _vmem_capacity_bytes()
    block_budget = min(capacity // 2, 48 << 20)
    tile_hw = _pick_tile_hw(hw_pad, n_segment, c_in, c_out, itemsize,
                            block_budget, max_tile_hw)

    # v7x megacore: keep >=2 grid steps on a parallel axis when the batch axis
    # alone can't feed both TensorCores.
    if n_batch < 2 and hw_pad // tile_hw < 2 and hw_pad >= 256:
        t = tile_hw - 128
        while t >= 128:
            if hw_pad % t == 0 and hw_pad // t >= 2:
                tile_hw = t
                break
            t -= 128

    # Explicit VMEM limit sized to double-buffered blocks + in-kernel temps.
    in_block = n_segment * c_in * tile_hw * itemsize
    out_block = n_segment * c_out * tile_hw * itemsize
    temps = n_segment * tile_hw * (c_in * itemsize + c_out * 4)
    wb_bytes = 2 * (c_out * c_in + c_out) * itemsize
    needed = 2 * (in_block + out_block) + temps + wb_bytes
    vmem_limit = int(min(capacity * 0.9, max(32 << 20, needed + (4 << 20))))

    cost = pl.CostEstimate(
        flops=2 * nt * hw_pad * c_in * c_out,
        transcendentals=0,
        bytes_accessed=(nt * (c_in + c_out) * hw_pad + c_out * c_in + c_out) * itemsize,
    )

    out = pl.pallas_call(
        functools.partial(_ts_conv_kernel, fold=fold),
        out_shape=jax.ShapeDtypeStruct((n_batch, n_segment, c_out, hw_pad), x_r.dtype),
        grid_spec=pltpu.PrefetchScalarGridSpec(
            num_scalar_prefetch=0,
            grid=(n_batch, hw_pad // tile_hw),
            in_specs=[
                pl.BlockSpec((1, n_segment, c_in, tile_hw), lambda b, s: (b, 0, 0, s)),
                pl.BlockSpec((c_out, c_in), lambda b, s: (0, 0)),
                pl.BlockSpec((c_out, 1), lambda b, s: (0, 0)),
            ],
            out_specs=pl.BlockSpec((1, n_segment, c_out, tile_hw),
                                   lambda b, s: (b, 0, 0, s)),
        ),
        compiler_params=pltpu.CompilerParams(
            dimension_semantics=("parallel", "parallel"),
            vmem_limit_bytes=vmem_limit),
        cost_estimate=cost,
    )(x_r, w_mat, b_col)

    out = out.reshape(nt, c_out, hw_pad)[..., :hw]
    return out.reshape(nt, c_out, h, w)


def _reference(x, weight, bias, n_segment=3, fold_div=8):
    """Pure-JAX mirror of the PyTorch forward (zero-filled shift + 1x1 conv)."""
    nt, c, h, w = x.shape
    nb = nt // n_segment
    xr = x.reshape(nb, n_segment, c, h, w)
    fold = c // fold_div
    out = jnp.zeros_like(xr)
    out = out.at[:, :-1, :fold].set(xr[:, 1:, :fold])
    out = out.at[:, 1:, fold:2 * fold].set(xr[:, :-1, fold:2 * fold])
    out = out.at[:, :, 2 * fold:].set(xr[:, :, 2 * fold:])
    out = out.reshape(nt, c, h, w)
    y = jnp.einsum('nchw,oc->nohw', out, weight[:, :, 0, 0])
    return y + bias[None, :, None, None]


if __name__ == "__main__":
    n_segment, fold_div = 3, 8
    n_batch, c, h, w = 2, 16, 16, 16
    nt = n_batch * n_segment

    key = jax.random.PRNGKey(0)
    kx, kw, kb = jax.random.split(key, 3)
    x = jax.random.normal(kx, (nt, c, h, w), dtype=jnp.float32)
    weight = jax.random.normal(kw, (c, c, 1, 1), dtype=jnp.float32) * 0.1
    bias = jax.random.normal(kb, (c,), dtype=jnp.float32) * 0.1

    y_ref = _reference(x, weight, bias, n_segment=n_segment, fold_div=fold_div)

    # fp32 path: tight correctness check vs the PyTorch-equivalent reference.
    y32 = temporal_shift_conv(x, weight, bias, n_segment=n_segment,
                              fold_div=fold_div, compute_dtype=jnp.float32)
    y32 = jax.block_until_ready(y32)
    assert y32.shape == (nt, c, h, w)
    assert jnp.allclose(y32, y_ref, atol=1e-4, rtol=1e-4), "fp32 mismatch vs reference"

    # Default (bf16 storage) perf path: loose check, fp32 accumulation retained.
    ybf = temporal_shift_conv(x, weight, bias, n_segment=n_segment, fold_div=fold_div)
    ybf = jax.block_until_ready(ybf)
    assert ybf.shape == (nt, c, h, w)
    assert jnp.allclose(ybf.astype(jnp.float32), y_ref, atol=5e-2, rtol=5e-2), \
        "bf16 mismatch vs reference"

    # TODO(synk): arbitrary wrapped `net` modules other than a 1x1 Conv2d are not
    # fused; only the canonical TSM (shift + 1x1 conv) hot path is in the kernel.
    print("KERNEL_OK")
</pallas_src>

<mosaic_0001>
module attributes {stable_mosaic.version = 11 : i64} {
  func.func @_ts_conv_kernel(%arg0: i32, %arg1: i32, %arg2: memref<1x3x16x256xf32, #tpu.memory_space<vmem>>, %arg3: memref<16x16xf32, #tpu.memory_space<vmem>>, %arg4: memref<16x1xf32, #tpu.memory_space<vmem>>, %arg5: memref<1x3x16x256xf32, #tpu.memory_space<vmem>>) attributes {dimension_semantics = [#tpu.dimension_semantics<parallel>, #tpu.dimension_semantics<parallel>], iteration_bounds = array<i64: 2, 1>, scalar_prefetch = 0 : i64, scratch_operands = 0 : i64, tpu.core_type = #tpu.core_type<tc>, window_params = [{transform_indices = @transform_0, window_bounds = array<i64: 1, 3, 16, 256>}, {pipeline_mode = #tpu.pipeline_mode<synchronous>, transform_indices = @transform_1, window_bounds = array<i64: 16, 16>}, {pipeline_mode = #tpu.pipeline_mode<synchronous>, transform_indices = @transform_2, window_bounds = array<i64: 16, 1>}, {transform_indices = @transform_3, window_bounds = array<i64: 1, 3, 16, 256>}]} {
    %c0 = arith.constant 0 : index
    %c0_0 = arith.constant 0 : index
    %0 = vector.load %arg3[%c0, %c0_0] : memref<16x16xf32, #tpu.memory_space<vmem>>, vector<16x16xf32>
    %c0_1 = arith.constant 0 : index
    %c0_2 = arith.constant 0 : index
    %1 = vector.load %arg4[%c0_1, %c0_2] : memref<16x1xf32, #tpu.memory_space<vmem>>, vector<16x1xf32>
    %2 = tpu.iota {dimensions = array<i32: 0>} : vector<16x256xi32>
    %c2_i32 = arith.constant 2 : i32
    %3 = vector.broadcast %c2_i32 : i32 to vector<16x256xi32>
    %4 = arith.cmpi slt, %2, %3 : vector<16x256xi32>
    %c4_i32 = arith.constant 4 : i32
    %5 = vector.broadcast %c4_i32 : i32 to vector<16x256xi32>
    %6 = arith.cmpi slt, %2, %5 : vector<16x256xi32>
    %cst = arith.constant 0.000000e+00 : f32
    %7 = vector.broadcast %cst : f32 to vector<16x256xf32>
    %c0_3 = arith.constant 0 : index
    %c0_4 = arith.constant 0 : index
    %c0_5 = arith.constant 0 : index
    %c0_6 = arith.constant 0 : index
    %8 = vector.load %arg2[%c0_3, %c0_4, %c0_5, %c0_6] : memref<1x3x16x256xf32, #tpu.memory_space<vmem>>, vector<1x1x16x256xf32>
    %9 = vector.shape_cast %8 : vector<1x1x16x256xf32> to vector<16x256xf32>
    %c0_7 = arith.constant 0 : index
    %c1 = arith.constant 1 : index
    %c0_8 = arith.constant 0 : index
    %c0_9 = arith.constant 0 : index
    %10 = vector.load %arg2[%c0_7, %c1, %c0_8, %c0_9] : memref<1x3x16x256xf32, #tpu.memory_space<vmem>>, vector<1x1x16x256xf32>
    %11 = vector.shape_cast %10 : vector<1x1x16x256xf32> to vector<16x256xf32>
    %12 = arith.select %6, %7, %9 : vector<16x256xi1>, vector<16x256xf32>
    %13 = arith.select %4, %11, %12 : vector<16x256xi1>, vector<16x256xf32>
    %c0_10 = arith.constant 0 : index
    %c2 = arith.constant 2 : index
    %c0_11 = arith.constant 0 : index
    %c0_12 = arith.constant 0 : index
    %14 = vector.load %arg2[%c0_10, %c2, %c0_11, %c0_12] : memref<1x3x16x256xf32, #tpu.memory_space<vmem>>, vector<1x1x16x256xf32>
    %15 = vector.shape_cast %14 : vector<1x1x16x256xf32> to vector<16x256xf32>
    %16 = arith.select %6, %9, %11 : vector<16x256xi1>, vector<16x256xf32>
    %17 = arith.select %4, %15, %16 : vector<16x256xi1>, vector<16x256xf32>
    %18 = arith.select %6, %11, %15 : vector<16x256xi1>, vector<16x256xf32>
    %19 = arith.select %4, %7, %18 : vector<16x256xi1>, vector<16x256xf32>
    %20 = tpu.concatenate %13, %17, %19 in 1 : vector<16x256xf32>, vector<16x256xf32>, vector<16x256xf32> -> vector<16x768xf32>
    %cst_13 = arith.constant dense<0.000000e+00> : vector<16x768xf32>
    %21 = tpu.matmul %0, %20, %cst_13 {dimension_numbers = #tpu.dot_dimension_numbers<[1], [0], [0], [1], [0, 0, 1, 1], [], []>} : vector<16x16xf32>, vector<16x768xf32>, vector<16x768xf32> -> vector<16x768xf32>
    %22 = vector.broadcast %1 : vector<16x1xf32> to vector<16x768xf32>
    %23 = arith.addf %21, %22 : vector<16x768xf32>
    %24 = vector.extract_strided_slice %23 {offsets = [0, 0], sizes = [16, 256], strides = [1, 1]} : vector<16x768xf32> to vector<16x256xf32>
    %c0_14 = arith.constant 0 : index
    %c0_15 = arith.constant 0 : index
    %c0_16 = arith.constant 0 : index
    %c0_17 = arith.constant 0 : index
    %25 = vector.load %arg5[%c0_14, %c0_15, %c0_16, %c0_17] : memref<1x3x16x256xf32, #tpu.memory_space<vmem>>, vector<1x1x16x256xf32>
    %26 = vector.shape_cast %25 : vector<1x1x16x256xf32> to vector<16x256xf32>
    %27 = vector.shape_cast %24 : vector<16x256xf32> to vector<1x1x16x256xf32>
    tpu.vector_store %arg5[%c0_14, %c0_15, %c0_16, %c0_17], %27 {strides = array<i32>} : memref<1x3x16x256xf32, #tpu.memory_space<vmem>>, vector<1x1x16x256xf32>,
    %28 = vector.extract_strided_slice %23 {offsets = [0, 256], sizes = [16, 256], strides = [1, 1]} : vector<16x768xf32> to vector<16x256xf32>
    %c0_18 = arith.constant 0 : index
    %c1_19 = arith.constant 1 : index
    %c0_20 = arith.constant 0 : index
    %c0_21 = arith.constant 0 : index
    %29 = vector.load %arg5[%c0_18, %c1_19, %c0_20, %c0_21] : memref<1x3x16x256xf32, #tpu.memory_space<vmem>>, vector<1x1x16x256xf32>
    %30 = vector.shape_cast %29 : vector<1x1x16x256xf32> to vector<16x256xf32>
    %31 = vector.shape_cast %28 : vector<16x256xf32> to vector<1x1x16x256xf32>
    tpu.vector_store %arg5[%c0_18, %c1_19, %c0_20, %c0_21], %31 {strides = array<i32>} : memref<1x3x16x256xf32, #tpu.memory_space<vmem>>, vector<1x1x16x256xf32>,
    %32 = vector.extract_strided_slice %23 {offsets = [0, 512], sizes = [16, 256], strides = [1, 1]} : vector<16x768xf32> to vector<16x256xf32>
    %c0_22 = arith.constant 0 : index
    %c2_23 = arith.constant 2 : index
    %c0_24 = arith.constant 0 : index
    %c0_25 = arith.constant 0 : index
    %33 = vector.load %arg5[%c0_22, %c2_23, %c0_24, %c0_25] : memref<1x3x16x256xf32, #tpu.memory_space<vmem>>, vector<1x1x16x256xf32>
    %34 = vector.shape_cast %33 : vector<1x1x16x256xf32> to vector<16x256xf32>
    %35 = vector.shape_cast %32 : vector<16x256xf32> to vector<1x1x16x256xf32>
    tpu.vector_store %arg5[%c0_22, %c2_23, %c0_24, %c0_25], %35 {strides = array<i32>} : memref<1x3x16x256xf32, #tpu.memory_space<vmem>>, vector<1x1x16x256xf32>,
    return
  }
  func.func @transform_0(%arg0: i32, %arg1: i32) -> (i32, i32, i32, i32) {
    %c0_i32 = arith.constant 0 : i32
    %c0_i32_0 = arith.constant 0 : i32
    %c0_i32_1 = arith.constant 0 : i32
    return %arg0, %c0_i32, %c0_i32_0, %arg1 : i32, i32, i32, i32
  }
  func.func @transform_1(%arg0: i32, %arg1: i32) -> (i32, i32) {
    %c0_i32 = arith.constant 0 : i32
    %c0_i32_0 = arith.constant 0 : i32
    %c0_i32_1 = arith.constant 0 : i32
    return %c0_i32, %c0_i32_0 : i32, i32
  }
  func.func @transform_2(%arg0: i32, %arg1: i32) -> (i32, i32) {
    %c0_i32 = arith.constant 0 : i32
    %c0_i32_0 = arith.constant 0 : i32
    %c0_i32_1 = arith.constant 0 : i32
    return %c0_i32, %c0_i32_0 : i32, i32
  }
  func.func @transform_3(%arg0: i32, %arg1: i32) -> (i32, i32, i32, i32) {
    %c0_i32 = arith.constant 0 : i32
    %c0_i32_0 = arith.constant 0 : i32
    %c0_i32_1 = arith.constant 0 : i32
    return %arg0, %c0_i32, %c0_i32_0, %arg1 : i32, i32, i32, i32
  }
}

</mosaic_0001>

<bundles_post_ra>
// kernel: tpu_custom_call.1
= control target key start
LH: loop header
LB: loop body
LE: loop exit
PB: predicated region body
PF: predicated region fallthrough
CT: control target
= control target key end

     0   :  { %8 = vsyncpa [#allocation3], 0  ;;  %s1142_s0 = inlined_call_operand.hbm [shape: f32[2,3,16,256], index: 0, kind: input, shape index: {}]   ;;  %s1143_s1 = inlined_call_operand.vmem [shape: f32[16,16], index: 1, kind: input, shape index: {}]   ;;  %s1144_s2 = inlined_call_operand.vmem [shape: f32[16,1], index: 2, kind: input, shape index: {}]   ;;  %s1145_s3 = inlined_call_operand.hbm [shape: f32[2,3,16,256], index: 3, kind: output, shape index: {}]  }
   0x1   :  { %10 = vsyncpa [#allocation3 + $0x1], 0 }
   0x2   :  { %11 = vsyncpa [#allocation4], 0 }
   0x3   :  { %13 = vsyncpa [#allocation4 + $0x1], 0  ;;  %s891_s12 = smov 0   ;;  %s893_s13 = smov 0  }
   0x4   :  { %s895_s14 = smov 0   ;;  %s897_s15 = smov 0  }
   0x5   :  { %s899_s16 = smov 0   ;;  %s901_s17 = smov 0  }
   0x6 LB: > { %s623_s18 = sadd.s32 4294967295, %s860_s17   ;;  %s624_s19 = sadd.s32 4294967294, %s860_s17   ;;  %s860_s17 = sphi %s901_s17, %s19_s17   ;;  %s856_s16 = sphi %s899_s16, %s1164_s16   ;;  %s852_s15 = sphi %s897_s15, %s1163_s15   ;;  %s848_s14 = sphi %s895_s14, %s1162_s14   ;;  %s844_s13 = sphi %s893_s13, %s1161_s13   ;;  %s840_s12 = sphi %s891_s12, %s1160_s12  }
   0x7   : > { %s31_s20 = sadd.s32 1, %s856_s16  ;;  %s40_s21 = sadd.s32 1, %s848_s14 }
   0x8   : > { %p33_p0 = scmp.ge.s32.totalorder %s31_s20, 2  ;;  %p47_p1 = scmp.ne.s32.totalorder %s848_s14, %s844_s13 }
   0x9   : > { %p48_p2 = scmp.eq.s32.totalorder %s860_s17, 0  ;;  %p53_p3 = scmp.ne.s32.totalorder %s844_s13, %s840_s12 }
   0xa   : > { %s1166_s20 = smov (%p33_p0, %s31_s20), 0  ;;  %p54_p5 = scmp.eq.s32.totalorder %s623_s18, 0 }
   0xb   : > { %p932_p4 = por %p48_p2, %p47_p1  ;;  %s35_s23 = ssub.s32 %s856_s16, %s1166_s20 }
   0xc   : > { %p121_p6 = scmp.eq.s32.totalorder %s623_s18, 1  ;;  %p38_p7 = scmp.eq.s32.totalorder %s35_s23, 0 }
   0xd   : > { %p938_p8 = por %p54_p5, %p53_p3  ;;  %p127_p10 = scmp.eq.s32.totalorder %s624_s19, 1 }
   0xe   : > { %p942_p9 = por %p121_p6, %p47_p1  ;;  %p690_p13 = scmp.lt.s32.totalorder %s860_s17, 2 }
   0xf   : > { %s947_s26 = scalar_select %p38_p7, %s848_s14, %s40_s21  }
  0x10   : > { %s1149_s25 = scalar_select %p942_p9, 1, 0 }
  0x11   : > { %p949_p11 = por %p127_p10, %p53_p3  ;;  %s153_s28 = sand.u32 1, %s848_s14  }
  0x12   : > { %s674_s29 = smul.u32 96, %s153_s28  ;;  %p959_p0 = pnand %p690_p13, %p932_p4 }
  0x13   : > { %s1150_s27 = scalar_select %p949_p11, 1, 0 }
  0x14   : > { %s675_s30 = smul.u32 1536, %s856_s16  ;;  %s157_s8 = scalar_lea.vmem [#allocation2], %s674_s29 }
  0x15   : > { %s166_s9 = sshll.u32 %s157_s8, 4  ;;  %s971_s10 = scalar_lea.sflag [#allocation3], %s153_s28  ;;  %s968_s9 = int_to_ptr.vmem [resolvable:$true] %s166_s9 }
  0x16   : > { %s966_s7 = scalar_lea.hbm %s1142_s0, %s675_s30  ;;  %p750_p3 = pneg %p959_p0 }
  0x17   : > { %s748_s11 = scalar_lea.hbm %s966_s7, 1536  ;;  %s753_s21 = scalar_lea.hbm %s1142_s0, 3072 }
  0x18   : > { %p749_p2 = scmp.ne.s32.totalorder %s966_s7, %s748_s11  ;;  %p754_p6 = scmp.lt.u32.totalorder %s966_s7, %s1142_s0 }
  0x19   : > { %p755_p7 = scmp.lt.u32.totalorder %s753_s21, %s748_s11  ;;  %p757_p13 = scmp.lt.u32.totalorder %s748_s11, %s966_s7 }
  0x1a   : > { %p751_p4 = pnand %p750_p3, %p749_p2 }
  0x1b   : > { %p756_p10 = por %p755_p7, %p754_p6 }
  0x1c   : > { %p752_p5 = pneg %p751_p4 }
  0x1d   : > { %p758_p12 = por %p757_p13, %p756_p10 }
  0x1f   : > { %p759_p1 = pnand %p758_p12, %p752_p5 }
  0x21   : > { %762 = shalt.err (!%p759_p1)
}
  0x22   : > { %s763_s28 = scalar_lea.vmem %s968_s9, 1536  ;;  %s862_s29 = smov [#allocation2]  }
  0x23   : > { %p764_p2 = scmp.ne.s32.totalorder %s968_s9, %s763_s28  ;;  %s768_s30 = sshll.u32 %s862_s29, 4  ;;  %s769_s30 = int_to_ptr.vmem [resolvable:$false] %s768_s30 }
  0x24   : > { %s770_s5 = scalar_lea.vmem %s769_s30, 3072  ;;  %p771_p9 = scmp.lt.s32.totalorder %s968_s9, %s769_s30 }
  0x25   : > { %p766_p4 = pnand %p764_p2, %p750_p3  ;;  %p772_p6 = scmp.lt.s32.totalorder %s770_s5, %s763_s28 }
  0x27   : > { %p767_p11 = pneg %p766_p4  ;;  %p773_p7 = por %p772_p6, %p771_p9 }
  0x29   : > { %p774_p10 = pnand %p773_p7, %p767_p11 }
  0x2b   : > { %777 = shalt.err (!%p774_p10)
}
  0x2c   : > { %s863_s6 = smov 256   ;;  %s864_s8 = smov 16  }
  0x2d   : > { %685 = dma.hbm_to_vmem [thread:$0]  (!%p959_p0), %s966_s7, 1536, %s968_s9, %s971_s10, %s863_s6, %s863_s6, %s864_s8  }
  0x2e   : > { %p174_p12 = scmp.lt.s32.totalorder %s860_s17, 3  ;;  %p1152_p1 = scmp.ge.s32.totalorder %s860_s17, 1 }
  0x30   : > { %p175_p3 = pnand %p1152_p1, %p174_p12 }
  0x31   : > { %s1003_s11 = sand.u32 (!%p175_p3), 1, %s844_s13  }
  0x32   : > { %178 = sbr.rel (%p175_p3) target bundleno = 309 (0x135), region = 32  ;;  %s181_s19 = scalar_lea.sflag (!%p175_p3), [#allocation3], %s1003_s11 }
  0x33   : > { %s676_s18 = smul.u32 (!%p175_p3), 96, %s1003_s11 }
  0x35   : > { %s1009_s21 = scalar_lea.vmem (!%p175_p3), [#allocation2], %s676_s18 }
  0x39   : > { %831 = dma.done.wait (%p938_p8), %s181_s19, 1536  }
  0x3a   : > { %833 = vsyncadd (%p938_p8), %s181_s19, 4294965760  ;;  %v213_v0 = vlaneseq  ;;  %v865_v1 = vmov 0.0   ;;  %v866_v3 = vmov 0   ;;  %v221_v5 = vld [vmem:[%s1009_s21 + $0x8] sm:$0xff]  ;;  %v223_v6 = vld [vmem:[%s1009_s21 + $0x18] sm:$0xff]  ;;  %vm867_vm3 = vmmov 1  }
  0x3b   : > { %339 = vmatprep.mubr.f32.mxu0 %v865_v1  ;;  %345 = vmatprep.mubr.f32.mxu1 %v865_v1  ;;  %v630_v7 = vld [vmem:[%s1009_s21 + $0x28] sm:$0xff]  ;;  %v220_v11 = vld [vmem:[%s1009_s21] sm:$0xff]  ;;  %v222_v12 = vld [vmem:[%s1009_s21 + $0x10] sm:$0xff]  ;;  %vm268_vm5 = vcmask 130048   ;;  %s1072_s29 = scalar_lea.vmem [#allocation5], %s676_s18  ;;  %s677_s30 = smul.u32 1536, %s852_s15 }
  0x3c   : > { %v214_v2 = vshrl.u32 %v213_v0, 7  ;;  %747 = vset.pattern.permute.xlu0 %v866_v3  ;;  %v634_v9 = vld [vmem:[%s1009_s21 + $0x48] sm:$0xff]  ;;  %v629_v15 = vld [vmem:[%s1009_s21 + $0x20] sm:$0xff]  ;;  %v635_v21 = vld [vmem:[%s1009_s21 + $0x50] sm:$0xff]  ;;  %s536_s5 = sshll.u32 %s1072_s29, 4  ;;  %s521_s18 = scalar_lea.sflag [#allocation4], %s1003_s11  ;;  %s1089_s5 = int_to_ptr.vmem [resolvable:$true] %s536_s5 }
  0x3d   : > { %v633_v17 = vld [vmem:[%s1009_s21 + $0x40] sm:$0xff]  ;;  %v632_v24 = vld [vmem:[%s1009_s21 + $0x38] sm:$0xff]  ;;  %v631_v29 = vld [vmem:[%s1009_s21 + $0x30] sm:$0xff]  ;;  %s1087_s8 = scalar_lea.hbm %s1145_s3, %s677_s30  ;;  %s778_s19 = scalar_lea.vmem %s1089_s5, 1536 }
  0x3e   : > { %vm216_vm0 = vcmp.lt.s32.totalorder %v214_v2, 2  ;;  %vm218_vm1 = vcmp.lt.s32.totalorder %v214_v2, 4  ;;  %v636_v27 = vld [vmem:[%s1009_s21 + $0x58] sm:$0xff]  ;;  %v211_v32 = vld [vmem:[%s1144_s2] sm:$0xff]  ;;  %v210_v35 = vld [vmem:[%s1143_s1 + $0x8] sm:$0xff]  ;;  %p779_p8 = scmp.ne.s32.totalorder %s1089_s5, %s778_s19  ;;  %p1157_p9 = scmp.ne.s32.totalorder %s1149_s25, 0 }
  0x3f   : > { %vm1016_vm2 = vmneg %vm216_vm0  ;;  %v230_v8 = vsel %vm218_vm1, 0.0, %v221_v5  ;;  %v243_v10 = vsel %vm218_vm1, %v221_v5, %v630_v7  ;;  %v251_v14 = vsel %vm218_vm1, %v630_v7, %v634_v9  ;;  %v229_v16 = vsel %vm218_vm1, 0.0, %v220_v11  ;;  %v209_v34 = vld [vmem:[%s1143_s1] sm:$0xff]  ;;  %260 = vperm.xlu0 %747, %v211_v32   ;;  %v212_v37 = vld [vmem:[%s1144_s2 + $0x8] sm:$0xff]  ;;  %s868_s21 = smov [#allocation5]  }
  0x40   : > { %v234_v13 = vsel %vm216_vm0, %v630_v7, %v230_v8  ;;  %v247_v18 = vsel %vm216_vm0, %v634_v9, %v243_v10  ;;  %v233_v20 = vsel %vm216_vm0, %v629_v15, %v229_v16  ;;  %v242_v22 = vsel %vm218_vm1, %v220_v11, %v629_v15  ;;  %vm1042_vm4 = vmpackc.low %vm867_vm3, %vm1016_vm2  ;;  %p780_p11 = pnand %p779_p8, %p1157_p9  ;;  %s782_s24 = sshll.u32 %s868_s21, 4  ;;  %s783_s24 = int_to_ptr.vmem [resolvable:$false] %s782_s24 }
  0x41   : > { %v658_v19 = vpack.c.bf16 %v223_v6, %v234_v13  ;;  %v250_v23 = vsel %vm218_vm1, %v629_v15, %v633_v17  ;;  %v660_v25 = vpack.c.bf16 %v222_v12, %v233_v20  ;;  %v662_v26 = vpack.c.bf16 %v632_v24, %v247_v18  ;;  %s784_s4 = scalar_lea.vmem %s783_s24, 3072  ;;  %p785_p5 = scmp.lt.s32.totalorder %s1089_s5, %s783_s24 }
  0x42   : > { %v246_v30 = vsel %vm216_vm0, %v633_v17, %v242_v22  ;;  %v666_v31 = vpack.c.bf16 %v636_v27, %v251_v14  ;;  %v669_v33 = vpack.c.bf16 %v635_v21, %v250_v23  ;;  %p781_p0 = pneg %p780_p11  ;;  %p786_p13 = scmp.lt.s32.totalorder %s784_s4, %s778_s19 }
  0x43   : > { %659 = vmatprep.subr.bf16.mxu0 %v658_v19  ;;  %672 = vmatprep.subr.bf16.mxu1 %v658_v19  ;;  %v664_v36 = vpack.c.bf16 %v631_v29, %v246_v30 }
  0x44   : > { %661 = vmatpush1.bf16.msra.mxu0 %v660_v25  ;;  %673 = vmatpush1.bf16.msra.mxu1 %v660_v25  ;;  %p787_p2 = por %p786_p13, %p785_p5 }
  0x45   : > { %663 = vmatprep.subr.bf16.mxu1 %v662_v26  ;;  %668 = vmatprep.subr.msk.bf16.mxu0 %vm1042_vm4, %v666_v31 }
  0x46   : > { %265 = vperm.xlu0 %747, %v212_v37   ;;  %p788_p4 = pnand %p787_p2, %p781_p0 }
  0x47   : > { %637 = vmatmul.mubr.msk.f32.vlgmr.msra.gmra.mrb[0].mxu0 %vm268_vm5, %v209_v34  ;;  %638 = vmatmul.mubr.msk.f32.vlgmr.msra.gmra.mrb[0].mxu1 %vm268_vm5, %v210_v35 }
  0x48   : > { %665 = vmatpush1.bf16.msra.mxu1 %v664_v36  ;;  %671 = vmatpush1.bf16.msk.msra.mxu0 %vm1042_vm4, %v669_v33 }
  0x49   : > { %416 = vmatprep.mubr.f32.mxu1 %v865_v1  ;;  %493 = vmatprep.mubr.f32.mxu0 %v865_v1 }
  0x4b   : > { %639 = vmatmul.mubr.msk.f32.vlgmr.msra.gmra.mrb[2].mxu1 %vm268_vm5, %v209_v34  ;;  %645 = vmatmul.mubr.msk.f32.vlgmr.msra.gmra.mrb[2].mxu0 %vm268_vm5, %v209_v34 }
  0x4c   : > { %422 = vmatprep.mubr.f32.mxu1 %v865_v1  ;;  %499 = vmatprep.mubr.f32.mxu0 %v865_v1 }
  0x4f   : > { %640 = vmatmul.mubr.msk.f32.gmra.mrb[4].mxu1 %vm268_vm5, %v210_v35  ;;  %646 = vmatmul.mubr.msk.f32.gmra.mrb[4].mxu0 %vm268_vm5, %v210_v35 }
  0xbe   : > { %v261_v38 = vpop.permute.xlu0 %260 }
  0xc5   : > { %v266_v39 = vpop.permute.xlu0 %265 }
 0x11a   : > { %v341_v40 = vpop.f32.mrb[0].mxu0  ;;  %v347_v41 = vpop.f32.mrb[0].mxu1 }
 0x11b   : > { %v342_v42 = vadd.f32 %v341_v40, %v261_v38  ;;  %v348_v43 = vadd.f32 %v347_v41, %v266_v39  ;;  %v343_v44 = vpop.f32.mrb[1].mxu0  ;;  %v349_v45 = vpop.f32.mrb[1].mxu1 }
 0x11c   : > { %v344_v46 = vadd.f32 %v343_v44, %v261_v38  ;;  %v350_v47 = vadd.f32 %v349_v45, %v266_v39 }
 0x11d   : > { %506 = vst [vmem:[%s1072_s29] sm:$0xff] %v342_v42  ;;  %508 = vst [vmem:[%s1072_s29 + $0x10] sm:$0xff] %v348_v43 }
 0x11e   : > { %507 = vst [vmem:[%s1072_s29 + $0x8] sm:$0xff] %v344_v46  ;;  %509 = vst [vmem:[%s1072_s29 + $0x18] sm:$0xff] %v350_v47  ;;  %v418_v48 = vpop.f32.mrb[2].mxu1  ;;  %v495_v49 = vpop.f32.mrb[2].mxu0 }
 0x11f   : > { %v419_v50 = vadd.f32 %v418_v48, %v261_v38  ;;  %v496_v51 = vadd.f32 %v495_v49, %v261_v38  ;;  %v420_v52 = vpop.f32.mrb[3].mxu1  ;;  %v497_v53 = vpop.f32.mrb[3].mxu0 }
 0x120   : > { %v421_v54 = vadd.f32 %v420_v52, %v261_v38  ;;  %v498_v55 = vadd.f32 %v497_v53, %v261_v38 }
 0x121   : > { %647 = vst [vmem:[%s1072_s29 + $0x20] sm:$0xff] %v419_v50  ;;  %651 = vst [vmem:[%s1072_s29 + $0x40] sm:$0xff] %v496_v51 }
 0x122   : > { %648 = vst [vmem:[%s1072_s29 + $0x28] sm:$0xff] %v421_v54  ;;  %652 = vst [vmem:[%s1072_s29 + $0x48] sm:$0xff] %v498_v55  ;;  %v424_v56 = vpop.f32.mrb[4].mxu1  ;;  %v501_v57 = vpop.f32.mrb[4].mxu0 }
 0x123   : > { %v425_v58 = vadd.f32 %v424_v56, %v266_v39  ;;  %v502_v59 = vadd.f32 %v501_v57, %v266_v39  ;;  %v426_v60 = vpop.f32.mrb[5].mxu1  ;;  %v503_v61 = vpop.f32.mrb[5].mxu0 }
 0x124   : > { %v427_v62 = vadd.f32 %v426_v60, %v266_v39  ;;  %v504_v63 = vadd.f32 %v503_v61, %v266_v39 }
 0x125   : > { %649 = vst [vmem:[%s1072_s29 + $0x30] sm:$0xff] %v425_v58  ;;  %653 = vst [vmem:[%s1072_s29 + $0x50] sm:$0xff] %v502_v59 }
 0x126   : > { %650 = vst [vmem:[%s1072_s29 + $0x38] sm:$0xff] %v427_v62  ;;  %654 = vst [vmem:[%s1072_s29 + $0x58] sm:$0xff] %v504_v63 }
 0x127   : > { %791 = shalt.err (!%p788_p4)
}
 0x128   : > { %s792_s7 = scalar_lea.hbm %s1087_s8, 1536  ;;  %s796_s22 = scalar_lea.hbm %s1145_s3, 3072 }
 0x129   : > { %p793_p6 = scmp.ne.s32.totalorder %s1087_s8, %s792_s7  ;;  %p797_p12 = scmp.lt.u32.totalorder %s1087_s8, %s1145_s3 }
 0x12a   : > { %p798_p1 = scmp.lt.u32.totalorder %s796_s22, %s792_s7  ;;  %p800_p8 = scmp.lt.u32.totalorder %s792_s7, %s1087_s8 }
 0x12b   : > { %p794_p7 = pnand %p793_p6, %p1157_p9 }
 0x12c   : > { %p799_p3 = por %p798_p1, %p797_p12 }
 0x12d   : > { %p795_p10 = pneg %p794_p7 }
 0x12e   : > { %p801_p11 = por %p800_p8, %p799_p3 }
 0x130   : > { %p802_p0 = pnand %p801_p11, %p795_p10 }
 0x132   : > { %805 = shalt.err (!%p802_p0)
}
 0x133   : > { %s869_s29 = smov 256   ;;  %s870_s30 = smov 16  }
 0x134   : > { %680 = dma.vmem_to_hbm [thread:$0]  (%p1157_p9), %s1089_s5, 1536, %s1087_s8, %s521_s18, %s869_s29, %s869_s29, %s870_s30  }
 0x135 PF: > { %s551_s15 = sand.u32 1, %s840_s12   ;;  %p1158_p5 = scmp.ne.s32.totalorder %s1150_s27, 0 }
 0x136   : > { %p1159_p13 = scmp.ge.s32.totalorder %s860_s17, 2  ;;  %s552_s6 = scalar_lea.sflag [#allocation4], %s551_s15 }
 0x138   : > { %p687_p2 = pnand %p1159_p13, %p1158_p5 }
 0x13a   : > { %835 = dma.done.wait (!%p687_p2), %s552_s6, 1536  }
 0x13b   : > { %837 = vsyncadd (!%p687_p2), %s552_s6, 4294965760  ;;  %s19_s17 = sadd.s32 1, %s860_s17   ;;  %s1160_s12 = smov %s844_s13 }
 0x13c   : > { %p16_p4 = scmp.ge.s32.totalorder %s19_s17, 4   ;;  %s1161_s13 = smov %s848_s14 }
 0x13d   : > { %s1162_s14 = smov %s947_s26  ;;  %s1163_s15 = smov %s856_s16 }
 0x13e   : > { %s1164_s16 = smov %s1166_s20  ;;  %18 = sbr.rel (!%p16_p4) target bundleno = 6 (0x6), region = 81 }
 0x145   :  { %557 = vsyncpa [#allocation3], 1 }
 0x146   :  { %559 = vsyncpa [#allocation3 + $0x1], 1 }
 0x147   :  { %560 = vsyncpa [#allocation4], 1 }
 0x148   :  { %562 = vsyncpa [#allocation4 + $0x1], 1 }

</bundles_post_ra>
